<compile_context>
chip_gen: v5e
topology: v5e:2x2
jax: 0.10.0
libtpu: 0.0.40
codegen_flags: <defaults>
</compile_context>

<pallas_src>
import functools

import jax
import jax.numpy as jnp
from jax import lax
from jax.experimental import pallas as pl
from jax.experimental.pallas import tpu as pltpu


def _fire_kernel(x_ref, wsq_ref, bsq_ref, w1_ref, b1_ref, w3_ref, b3_ref,
                 out_ref, cols_ref, *, H, W):
    """One image per grid step, channels-first (C, H*W) layout.

    x_ref   : (Cin, H*W)   f32   input slab (1:1 with NCHW, no transpose)
    wsq_ref : (Sq, Cin)    bf16  squeeze 1x1 weight
    bsq_ref : (Sq, 1)      f32
    w1_ref  : (E1, Sq)     bf16  expand1x1 weight
    b1_ref  : (E1, 1)      f32
    w3_ref  : (E3, 9*Sq)   bf16  expand3x3 weight, col = (ky*3+kx)*Sq + c
    b3_ref  : (E3, 1)      f32
    out_ref : (E1+E3, H*W) f32   rows [0,E1) = expand1x1, [E1,..) = expand3x3
    cols_ref: (9*Sq, H*W)  f32   VMEM scratch: im2col of the squeeze act.
    """
    HW = H * W
    Sq = wsq_ref.shape[0]
    E1 = w1_ref.shape[0]

    # ---- squeeze 1x1 + ReLU: (Sq,Cin) @ (Cin,HW), bf16 in / f32 acc ----
    x_bf = x_ref[...].astype(jnp.bfloat16)
    s = jnp.dot(wsq_ref[...], x_bf, preferred_element_type=jnp.float32)
    s = jnp.maximum(s + bsq_ref[...], 0.0)                       # (Sq, HW) f32

    # ---- im2col straight into the VMEM scratch (no padded image, no
    #      tile-crossing reshapes).  Tap (ky,kx) is a static lane shift of
    #      the flat activation by off = (ky-1)*W + (kx-1); the flat zero-fill
    #      handles the h border, an explicit mask handles the w border. ----
    lane = lax.broadcasted_iota(jnp.int32, (1, HW), 1)
    w_pos = lane % W
    left_ok = w_pos >= 1            # valid when kx == 0 (dx = -1)
    right_ok = w_pos <= W - 2       # valid when kx == 2 (dx = +1)

    for ky in range(3):
        for kx in range(3):
            off = (ky - 1) * W + (kx - 1)
            if off == 0:
                tap = s
            elif off > 0:
                tap = jnp.concatenate(
                    [s[:, off:], jnp.zeros((Sq, off), s.dtype)], axis=1)
            else:
                tap = jnp.concatenate(
                    [jnp.zeros((Sq, -off), s.dtype), s[:, :off]], axis=1)
            if kx == 0:
                tap = jnp.where(left_ok, tap, 0.0)
            elif kx == 2:
                tap = jnp.where(right_ok, tap, 0.0)
            t = ky * 3 + kx
            cols_ref[t * Sq:(t + 1) * Sq, :] = tap

    # ---- expand1x1 (reuses s directly: zero wasted MACs) + expand3x3,
    #      both bf16 on the MXU with f32 accumulation; results land in the
    #      two contiguous channel ranges of the NCHW-layout output. ----
    e1 = jnp.dot(w1_ref[...], s.astype(jnp.bfloat16),
                 preferred_element_type=jnp.float32)
    out_ref[:E1, :] = jnp.maximum(e1 + b1_ref[...], 0.0).astype(out_ref.dtype)

    e3 = jnp.dot(w3_ref[...], cols_ref[...].astype(jnp.bfloat16),
                 preferred_element_type=jnp.float32)
    out_ref[E1:, :] = jnp.maximum(e3 + b3_ref[...], 0.0).astype(out_ref.dtype)


def pack_fire_params(params):
    """One-time repack of PyTorch OIHW conv weights into kernel layouts."""
    wsq, bsq = params["squeeze_w"], params["squeeze_b"]
    w1, b1 = params["exp1_w"], params["exp1_b"]
    w3, b3 = params["exp3_w"], params["exp3_b"]
    Sq, Cin = wsq.shape[0], wsq.shape[1]
    E1, E3 = w1.shape[0], w3.shape[0]
    # (E3, Sq, 3, 3) -> (E3, ky, kx, Sq) -> (E3, 9*Sq), col = (ky*3+kx)*Sq + c
    w3_p = jnp.transpose(w3, (0, 2, 3, 1)).reshape(E3, 9 * Sq)
    return {
        "wsq": jnp.asarray(wsq[:, :, 0, 0], jnp.bfloat16),         # (Sq, Cin)
        "bsq": jnp.asarray(bsq, jnp.float32).reshape(Sq, 1),
        "w1": jnp.asarray(w1[:, :, 0, 0], jnp.bfloat16),           # (E1, Sq)
        "b1": jnp.asarray(b1, jnp.float32).reshape(E1, 1),
        "w3": jnp.asarray(w3_p, jnp.bfloat16),                     # (E3, 9*Sq)
        "b3": jnp.asarray(b3, jnp.float32).reshape(E3, 1),
        "dims": (Cin, Sq, E1, E3),
    }


def fire_forward(x_nchw, packed):
    """Fused Fire forward. Accepts / returns NCHW (no HBM relayouts)."""
    Cin, Sq, E1, E3 = packed["dims"]
    C = E1 + E3
    N, Cx, H, W = x_nchw.shape
    assert Cx == Cin, (Cx, Cin)
    HW = H * W

    # NCHW -> (N, Cin, H*W): contiguous reshape, zero data movement.
    x_cf = x_nchw.reshape(N, Cin, HW).astype(jnp.float32)

    kernel = functools.partial(_fire_kernel, H=H, W=W)

    out = pl.pallas_call(
        kernel,
        out_shape=jax.ShapeDtypeStruct((N, C, HW), jnp.float32),
        grid=(N,),
        in_specs=[
            pl.BlockSpec((None, Cin, HW), lambda n: (n, 0, 0)),
            pl.BlockSpec((Sq, Cin), lambda n: (0, 0)),
            pl.BlockSpec((Sq, 1), lambda n: (0, 0)),
            pl.BlockSpec((E1, Sq), lambda n: (0, 0)),
            pl.BlockSpec((E1, 1), lambda n: (0, 0)),
            pl.BlockSpec((E3, 9 * Sq), lambda n: (0, 0)),
            pl.BlockSpec((E3, 1), lambda n: (0, 0)),
        ],
        out_specs=pl.BlockSpec((None, C, HW), lambda n: (n, 0, 0)),
        scratch_shapes=[pltpu.VMEM((9 * Sq, HW), jnp.float32)],
        compiler_params=pltpu.CompilerParams(
            dimension_semantics=("parallel",),
            vmem_limit_bytes=32 * 1024 * 1024),
    )(x_cf, packed["wsq"], packed["bsq"], packed["w1"], packed["b1"],
      packed["w3"], packed["b3"])

    # (N, C, H*W) -> NCHW: contiguous reshape, zero data movement.
    return out.reshape(N, C, H, W)


def fire_reference(x, params):
    """Pure-JAX NCHW f32 reference (matches PyTorch Fire.forward)."""
    def conv(inp, w, b, pad):
        y = lax.conv_general_dilated(
            inp, w, (1, 1), [(pad, pad), (pad, pad)],
            dimension_numbers=("NCHW", "OIHW", "NCHW"))
        return y + b.reshape(1, -1, 1, 1)

    s = jax.nn.relu(conv(x, params["squeeze_w"], params["squeeze_b"], 0))
    e1 = jax.nn.relu(conv(s, params["exp1_w"], params["exp1_b"], 0))
    e3 = jax.nn.relu(conv(s, params["exp3_w"], params["exp3_b"], 1))
    return jnp.concatenate([e1, e3], axis=1)


if __name__ == "__main__":
    # Small Fire config: Fire(inplanes=16, squeeze=8, expand1x1=16, expand3x3=16)
    inplanes, squeeze_planes, e1_planes, e3_planes = 16, 8, 16, 16
    N, H, W = 2, 16, 16

    key = jax.random.PRNGKey(0)
    ks = jax.random.split(key, 7)
    params = {
        "squeeze_w": 0.1 * jax.random.normal(ks[0], (squeeze_planes, inplanes, 1, 1), jnp.float32),
        "squeeze_b": 0.1 * jax.random.normal(ks[1], (squeeze_planes,), jnp.float32),
        "exp1_w":    0.1 * jax.random.normal(ks[2], (e1_planes, squeeze_planes, 1, 1), jnp.float32),
        "exp1_b":    0.1 * jax.random.normal(ks[3], (e1_planes,), jnp.float32),
        "exp3_w":    0.1 * jax.random.normal(ks[4], (e3_planes, squeeze_planes, 3, 3), jnp.float32),
        "exp3_b":    0.1 * jax.random.normal(ks[5], (e3_planes,), jnp.float32),
    }
    x = jax.random.normal(ks[6], (N, inplanes, H, W), jnp.float32)   # NCHW like PyTorch

    packed = pack_fire_params(params)          # one-time weight repack (bf16)
    out = jax.block_until_ready(fire_forward(x, packed))
    assert out.shape == (N, e1_planes + e3_planes, H, W), out.shape

    ref = fire_reference(x, params)
    err = float(jnp.max(jnp.abs(out - ref)))
    # bf16 MXU inputs -> looser tolerance vs the f32 XLA-conv reference.
    if not jnp.allclose(out, ref, atol=3e-2, rtol=3e-2):
        raise AssertionError(f"Pallas Fire mismatch vs reference, max abs err = {err:e}")

    print("KERNEL_OK")
</pallas_src>

<mosaic_0001>
module attributes {stable_mosaic.version = 11 : i64} {
  func.func @_fire_kernel(%arg0: i32, %arg1: memref<1x16x256xf32, #tpu.memory_space<vmem>>, %arg2: memref<8x16xbf16, #tpu.memory_space<vmem>>, %arg3: memref<8x1xf32, #tpu.memory_space<vmem>>, %arg4: memref<16x8xbf16, #tpu.memory_space<vmem>>, %arg5: memref<16x1xf32, #tpu.memory_space<vmem>>, %arg6: memref<16x72xbf16, #tpu.memory_space<vmem>>, %arg7: memref<16x1xf32, #tpu.memory_space<vmem>>, %arg8: memref<1x32x256xf32, #tpu.memory_space<vmem>>, %arg9: memref<72x256xf32, #tpu.memory_space<vmem>>) attributes {dimension_semantics = [#tpu.dimension_semantics<parallel>], iteration_bounds = array<i64: 2>, scalar_prefetch = 0 : i64, scratch_operands = 1 : i64, tpu.core_type = #tpu.core_type<tc>, window_params = [{transform_indices = @transform_0, window_bounds = array<i64: 1, 16, 256>}, {pipeline_mode = #tpu.pipeline_mode<synchronous>, transform_indices = @transform_1, window_bounds = array<i64: 8, 16>}, {pipeline_mode = #tpu.pipeline_mode<synchronous>, transform_indices = @transform_2, window_bounds = array<i64: 8, 1>}, {pipeline_mode = #tpu.pipeline_mode<synchronous>, transform_indices = @transform_3, window_bounds = array<i64: 16, 8>}, {pipeline_mode = #tpu.pipeline_mode<synchronous>, transform_indices = @transform_4, window_bounds = array<i64: 16, 1>}, {pipeline_mode = #tpu.pipeline_mode<synchronous>, transform_indices = @transform_5, window_bounds = array<i64: 16, 72>}, {pipeline_mode = #tpu.pipeline_mode<synchronous>, transform_indices = @transform_6, window_bounds = array<i64: 16, 1>}, {transform_indices = @transform_7, window_bounds = array<i64: 1, 32, 256>}]} {
    %c0 = arith.constant 0 : index
    %c0_0 = arith.constant 0 : index
    %c0_1 = arith.constant 0 : index
    %0 = vector.load %arg1[%c0, %c0_0, %c0_1] : memref<1x16x256xf32, #tpu.memory_space<vmem>>, vector<1x16x256xf32>
    %1 = vector.shape_cast %0 : vector<1x16x256xf32> to vector<16x256xf32>
    %2 = arith.truncf %1 : vector<16x256xf32> to vector<16x256xbf16>
    %c0_2 = arith.constant 0 : index
    %c0_3 = arith.constant 0 : index
    %3 = vector.load %arg2[%c0_2, %c0_3] : memref<8x16xbf16, #tpu.memory_space<vmem>>, vector<8x16xbf16>
    %cst = arith.constant dense<0.000000e+00> : vector<8x256xf32>
    %4 = tpu.matmul %3, %2, %cst {dimension_numbers = #tpu.dot_dimension_numbers<[1], [0], [0], [1], [0, 0, 1, 1], [], []>} : vector<8x16xbf16>, vector<16x256xbf16>, vector<8x256xf32> -> vector<8x256xf32>
    %c0_4 = arith.constant 0 : index
    %c0_5 = arith.constant 0 : index
    %5 = vector.load %arg3[%c0_4, %c0_5] : memref<8x1xf32, #tpu.memory_space<vmem>>, vector<8x1xf32>
    %6 = vector.broadcast %5 : vector<8x1xf32> to vector<8x256xf32>
    %7 = arith.addf %4, %6 : vector<8x256xf32>
    %cst_6 = arith.constant 0.000000e+00 : f32
    %8 = vector.broadcast %cst_6 : f32 to vector<8x256xf32>
    %9 = arith.maximumf %7, %8 : vector<8x256xf32>
    %10 = tpu.iota {dimensions = array<i32: 1>} : vector<1x256xi32>
    %c16_i32 = arith.constant 16 : i32
    %c0_i32 = arith.constant 0 : i32
    %11 = arith.cmpi eq, %c16_i32, %c0_i32 : i32
    %c1_i32 = arith.constant 1 : i32
    %12 = arith.select %11, %c1_i32, %c16_i32 : i32
    %13 = vector.broadcast %12 : i32 to vector<1x256xi32>
    %14 = arith.remsi %10, %13 : vector<1x256xi32>
    %c0_i32_7 = arith.constant 0 : i32
    %15 = vector.broadcast %c0_i32_7 : i32 to vector<1x256xi32>
    %16 = arith.cmpi ne, %14, %15 : vector<1x256xi32>
    %c0_i32_8 = arith.constant 0 : i32
    %17 = vector.broadcast %c0_i32_8 : i32 to vector<1x256xi32>
    %18 = arith.cmpi slt, %14, %17 : vector<1x256xi32>
    %c0_i32_9 = arith.constant 0 : i32
    %19 = arith.cmpi slt, %12, %c0_i32_9 : i32
    %20 = vector.broadcast %19 : i1 to vector<1x256xi1>
    %21 = vector.broadcast %20 : vector<1x256xi1> to vector<1x256xi1>
    %22 = arith.xori %18, %21 : vector<1x256xi1>
    %23 = arith.andi %22, %16 : vector<1x256xi1>
    %24 = vector.broadcast %12 : i32 to vector<1x256xi32>
    %25 = arith.addi %14, %24 : vector<1x256xi32>
    %26 = arith.select %23, %25, %14 : vector<1x256xi1>, vector<1x256xi32>
    %c1_i32_10 = arith.constant 1 : i32
    %27 = vector.broadcast %c1_i32_10 : i32 to vector<1x256xi32>
    %28 = arith.cmpi sge, %26, %27 : vector<1x256xi32>
    %c14_i32 = arith.constant 14 : i32
    %29 = vector.broadcast %c14_i32 : i32 to vector<1x256xi32>
    %30 = arith.cmpi sle, %26, %29 : vector<1x256xi32>
    %cst_11 = arith.constant 0.000000e+00 : f32
    %31 = vector.broadcast %cst_11 : f32 to vector<8x17xf32>
    %32 = vector.extract_strided_slice %9 {offsets = [0, 0], sizes = [8, 239], strides = [1, 1]} : vector<8x256xf32> to vector<8x239xf32>
    %33 = tpu.concatenate %31, %32 in 1 : vector<8x17xf32>, vector<8x239xf32> -> vector<8x256xf32>
    %cst_12 = arith.constant 0.000000e+00 : f32
    %34 = vector.shape_cast %28 : vector<1x256xi1> to vector<1x256xi1>
    %35 = vector.broadcast %34 : vector<1x256xi1> to vector<8x256xi1>
    %36 = vector.broadcast %cst_12 : f32 to vector<8x256xf32>
    %37 = arith.select %35, %33, %36 : vector<8x256xi1>, vector<8x256xf32>
    %c0_13 = arith.constant 0 : index
    %c0_14 = arith.constant 0 : index
    %38 = vector.load %arg9[%c0_13, %c0_14] : memref<72x256xf32, #tpu.memory_space<vmem>>, vector<8x256xf32>
    tpu.vector_store %arg9[%c0_13, %c0_14], %37 {strides = array<i32>} : memref<72x256xf32, #tpu.memory_space<vmem>>, vector<8x256xf32>,
    %cst_15 = arith.constant 0.000000e+00 : f32
    %39 = vector.broadcast %cst_15 : f32 to vector<8x16xf32>
    %40 = vector.extract_strided_slice %9 {offsets = [0, 0], sizes = [8, 240], strides = [1, 1]} : vector<8x256xf32> to vector<8x240xf32>
    %41 = tpu.concatenate %39, %40 in 1 : vector<8x16xf32>, vector<8x240xf32> -> vector<8x256xf32>
    %c8 = arith.constant 8 : index
    %c0_16 = arith.constant 0 : index
    %42 = vector.load %arg9[%c8, %c0_16] : memref<72x256xf32, #tpu.memory_space<vmem>>, vector<8x256xf32>
    tpu.vector_store %arg9[%c8, %c0_16], %41 {strides = array<i32>} : memref<72x256xf32, #tpu.memory_space<vmem>>, vector<8x256xf32>,
    %cst_17 = arith.constant 0.000000e+00 : f32
    %43 = vector.broadcast %cst_17 : f32 to vector<8x15xf32>
    %44 = vector.extract_strided_slice %9 {offsets = [0, 0], sizes = [8, 241], strides = [1, 1]} : vector<8x256xf32> to vector<8x241xf32>
    %45 = tpu.concatenate %43, %44 in 1 : vector<8x15xf32>, vector<8x241xf32> -> vector<8x256xf32>
    %cst_18 = arith.constant 0.000000e+00 : f32
    %46 = vector.shape_cast %30 : vector<1x256xi1> to vector<1x256xi1>
    %47 = vector.broadcast %46 : vector<1x256xi1> to vector<8x256xi1>
    %48 = vector.broadcast %cst_18 : f32 to vector<8x256xf32>
    %49 = arith.select %47, %45, %48 : vector<8x256xi1>, vector<8x256xf32>
    %c16 = arith.constant 16 : index
    %c0_19 = arith.constant 0 : index
    %50 = vector.load %arg9[%c16, %c0_19] : memref<72x256xf32, #tpu.memory_space<vmem>>, vector<8x256xf32>
    tpu.vector_store %arg9[%c16, %c0_19], %49 {strides = array<i32>} : memref<72x256xf32, #tpu.memory_space<vmem>>, vector<8x256xf32>,
    %cst_20 = arith.constant 0.000000e+00 : f32
    %51 = vector.broadcast %cst_20 : f32 to vector<8x1xf32>
    %52 = vector.extract_strided_slice %9 {offsets = [0, 0], sizes = [8, 255], strides = [1, 1]} : vector<8x256xf32> to vector<8x255xf32>
    %53 = tpu.concatenate %51, %52 in 1 : vector<8x1xf32>, vector<8x255xf32> -> vector<8x256xf32>
    %cst_21 = arith.constant 0.000000e+00 : f32
    %54 = vector.shape_cast %28 : vector<1x256xi1> to vector<1x256xi1>
    %55 = vector.broadcast %54 : vector<1x256xi1> to vector<8x256xi1>
    %56 = vector.broadcast %cst_21 : f32 to vector<8x256xf32>
    %57 = arith.select %55, %53, %56 : vector<8x256xi1>, vector<8x256xf32>
    %c24 = arith.constant 24 : index
    %c0_22 = arith.constant 0 : index
    %58 = vector.load %arg9[%c24, %c0_22] : memref<72x256xf32, #tpu.memory_space<vmem>>, vector<8x256xf32>
    tpu.vector_store %arg9[%c24, %c0_22], %57 {strides = array<i32>} : memref<72x256xf32, #tpu.memory_space<vmem>>, vector<8x256xf32>,
    %c32 = arith.constant 32 : index
    %c0_23 = arith.constant 0 : index
    %59 = vector.load %arg9[%c32, %c0_23] : memref<72x256xf32, #tpu.memory_space<vmem>>, vector<8x256xf32>
    tpu.vector_store %arg9[%c32, %c0_23], %9 {strides = array<i32>} : memref<72x256xf32, #tpu.memory_space<vmem>>, vector<8x256xf32>,
    %60 = vector.extract_strided_slice %9 {offsets = [0, 1], sizes = [8, 255], strides = [1, 1]} : vector<8x256xf32> to vector<8x255xf32>
    %cst_24 = arith.constant 0.000000e+00 : f32
    %61 = vector.broadcast %cst_24 : f32 to vector<8x1xf32>
    %62 = tpu.concatenate %60, %61 in 1 : vector<8x255xf32>, vector<8x1xf32> -> vector<8x256xf32>
    %cst_25 = arith.constant 0.000000e+00 : f32
    %63 = vector.shape_cast %30 : vector<1x256xi1> to vector<1x256xi1>
    %64 = vector.broadcast %63 : vector<1x256xi1> to vector<8x256xi1>
    %65 = vector.broadcast %cst_25 : f32 to vector<8x256xf32>
    %66 = arith.select %64, %62, %65 : vector<8x256xi1>, vector<8x256xf32>
    %c40 = arith.constant 40 : index
    %c0_26 = arith.constant 0 : index
    %67 = vector.load %arg9[%c40, %c0_26] : memref<72x256xf32, #tpu.memory_space<vmem>>, vector<8x256xf32>
    tpu.vector_store %arg9[%c40, %c0_26], %66 {strides = array<i32>} : memref<72x256xf32, #tpu.memory_space<vmem>>, vector<8x256xf32>,
    %68 = vector.extract_strided_slice %9 {offsets = [0, 15], sizes = [8, 241], strides = [1, 1]} : vector<8x256xf32> to vector<8x241xf32>
    %cst_27 = arith.constant 0.000000e+00 : f32
    %69 = vector.broadcast %cst_27 : f32 to vector<8x15xf32>
    %70 = tpu.concatenate %68, %69 in 1 : vector<8x241xf32>, vector<8x15xf32> -> vector<8x256xf32>
    %cst_28 = arith.constant 0.000000e+00 : f32
    %71 = vector.shape_cast %28 : vector<1x256xi1> to vector<1x256xi1>
    %72 = vector.broadcast %71 : vector<1x256xi1> to vector<8x256xi1>
    %73 = vector.broadcast %cst_28 : f32 to vector<8x256xf32>
    %74 = arith.select %72, %70, %73 : vector<8x256xi1>, vector<8x256xf32>
    %c48 = arith.constant 48 : index
    %c0_29 = arith.constant 0 : index
    %75 = vector.load %arg9[%c48, %c0_29] : memref<72x256xf32, #tpu.memory_space<vmem>>, vector<8x256xf32>
    tpu.vector_store %arg9[%c48, %c0_29], %74 {strides = array<i32>} : memref<72x256xf32, #tpu.memory_space<vmem>>, vector<8x256xf32>,
    %76 = vector.extract_strided_slice %9 {offsets = [0, 16], sizes = [8, 240], strides = [1, 1]} : vector<8x256xf32> to vector<8x240xf32>
    %cst_30 = arith.constant 0.000000e+00 : f32
    %77 = vector.broadcast %cst_30 : f32 to vector<8x16xf32>
    %78 = tpu.concatenate %76, %77 in 1 : vector<8x240xf32>, vector<8x16xf32> -> vector<8x256xf32>
    %c56 = arith.constant 56 : index
    %c0_31 = arith.constant 0 : index
    %79 = vector.load %arg9[%c56, %c0_31] : memref<72x256xf32, #tpu.memory_space<vmem>>, vector<8x256xf32>
    tpu.vector_store %arg9[%c56, %c0_31], %78 {strides = array<i32>} : memref<72x256xf32, #tpu.memory_space<vmem>>, vector<8x256xf32>,
    %80 = vector.extract_strided_slice %9 {offsets = [0, 17], sizes = [8, 239], strides = [1, 1]} : vector<8x256xf32> to vector<8x239xf32>
    %cst_32 = arith.constant 0.000000e+00 : f32
    %81 = vector.broadcast %cst_32 : f32 to vector<8x17xf32>
    %82 = tpu.concatenate %80, %81 in 1 : vector<8x239xf32>, vector<8x17xf32> -> vector<8x256xf32>
    %cst_33 = arith.constant 0.000000e+00 : f32
    %83 = vector.shape_cast %30 : vector<1x256xi1> to vector<1x256xi1>
    %84 = vector.broadcast %83 : vector<1x256xi1> to vector<8x256xi1>
    %85 = vector.broadcast %cst_33 : f32 to vector<8x256xf32>
    %86 = arith.select %84, %82, %85 : vector<8x256xi1>, vector<8x256xf32>
    %c64 = arith.constant 64 : index
    %c0_34 = arith.constant 0 : index
    %87 = vector.load %arg9[%c64, %c0_34] : memref<72x256xf32, #tpu.memory_space<vmem>>, vector<8x256xf32>
    tpu.vector_store %arg9[%c64, %c0_34], %86 {strides = array<i32>} : memref<72x256xf32, #tpu.memory_space<vmem>>, vector<8x256xf32>,
    %c0_35 = arith.constant 0 : index
    %c0_36 = arith.constant 0 : index
    %88 = vector.load %arg4[%c0_35, %c0_36] : memref<16x8xbf16, #tpu.memory_space<vmem>>, vector<16x8xbf16>
    %89 = arith.truncf %9 : vector<8x256xf32> to vector<8x256xbf16>
    %cst_37 = arith.constant dense<0.000000e+00> : vector<16x256xf32>
    %90 = tpu.matmul %88, %89, %cst_37 {dimension_numbers = #tpu.dot_dimension_numbers<[1], [0], [0], [1], [0, 0, 1, 1], [], []>} : vector<16x8xbf16>, vector<8x256xbf16>, vector<16x256xf32> -> vector<16x256xf32>
    %c0_38 = arith.constant 0 : index
    %c0_39 = arith.constant 0 : index
    %91 = vector.load %arg5[%c0_38, %c0_39] : memref<16x1xf32, #tpu.memory_space<vmem>>, vector<16x1xf32>
    %92 = vector.broadcast %91 : vector<16x1xf32> to vector<16x256xf32>
    %93 = arith.addf %90, %92 : vector<16x256xf32>
    %cst_40 = arith.constant 0.000000e+00 : f32
    %94 = vector.broadcast %cst_40 : f32 to vector<16x256xf32>
    %95 = arith.maximumf %93, %94 : vector<16x256xf32>
    %c0_41 = arith.constant 0 : index
    %c0_42 = arith.constant 0 : index
    %c0_43 = arith.constant 0 : index
    %96 = vector.load %arg8[%c0_41, %c0_42, %c0_43] : memref<1x32x256xf32, #tpu.memory_space<vmem>>, vector<1x16x256xf32>
    %97 = vector.shape_cast %96 : vector<1x16x256xf32> to vector<16x256xf32>
    %98 = vector.shape_cast %95 : vector<16x256xf32> to vector<1x16x256xf32>
    tpu.vector_store %arg8[%c0_41, %c0_42, %c0_43], %98 {strides = array<i32>} : memref<1x32x256xf32, #tpu.memory_space<vmem>>, vector<1x16x256xf32>,
    %c0_44 = arith.constant 0 : index
    %c0_45 = arith.constant 0 : index
    %99 = vector.load %arg6[%c0_44, %c0_45] : memref<16x72xbf16, #tpu.memory_space<vmem>>, vector<16x72xbf16>
    %c0_46 = arith.constant 0 : index
    %c0_47 = arith.constant 0 : index
    %100 = vector.load %arg9[%c0_46, %c0_47] : memref<72x256xf32, #tpu.memory_space<vmem>>, vector<72x256xf32>
    %101 = arith.truncf %100 : vector<72x256xf32> to vector<72x256xbf16>
    %cst_48 = arith.constant dense<0.000000e+00> : vector<16x256xf32>
    %102 = tpu.matmul %99, %101, %cst_48 {dimension_numbers = #tpu.dot_dimension_numbers<[1], [0], [0], [1], [0, 0, 1, 1], [], []>} : vector<16x72xbf16>, vector<72x256xbf16>, vector<16x256xf32> -> vector<16x256xf32>
    %c0_49 = arith.constant 0 : index
    %c0_50 = arith.constant 0 : index
    %103 = vector.load %arg7[%c0_49, %c0_50] : memref<16x1xf32, #tpu.memory_space<vmem>>, vector<16x1xf32>
    %104 = vector.broadcast %103 : vector<16x1xf32> to vector<16x256xf32>
    %105 = arith.addf %102, %104 : vector<16x256xf32>
    %cst_51 = arith.constant 0.000000e+00 : f32
    %106 = vector.broadcast %cst_51 : f32 to vector<16x256xf32>
    %107 = arith.maximumf %105, %106 : vector<16x256xf32>
    %c0_52 = arith.constant 0 : index
    %c16_53 = arith.constant 16 : index
    %c0_54 = arith.constant 0 : index
    %108 = vector.load %arg8[%c0_52, %c16_53, %c0_54] : memref<1x32x256xf32, #tpu.memory_space<vmem>>, vector<1x16x256xf32>
    %109 = vector.shape_cast %108 : vector<1x16x256xf32> to vector<16x256xf32>
    %110 = vector.shape_cast %107 : vector<16x256xf32> to vector<1x16x256xf32>
    tpu.vector_store %arg8[%c0_52, %c16_53, %c0_54], %110 {strides = array<i32>} : memref<1x32x256xf32, #tpu.memory_space<vmem>>, vector<1x16x256xf32>,
    return
  }
  func.func @transform_0(%arg0: i32) -> (i32, i32, i32) {
    %c0_i32 = arith.constant 0 : i32
    %c0_i32_0 = arith.constant 0 : i32
    %c0_i32_1 = arith.constant 0 : i32
    return %arg0, %c0_i32, %c0_i32_0 : i32, i32, i32
  }
  func.func @transform_1(%arg0: i32) -> (i32, i32) {
    %c0_i32 = arith.constant 0 : i32
    %c0_i32_0 = arith.constant 0 : i32
    %c0_i32_1 = arith.constant 0 : i32
    return %c0_i32, %c0_i32_0 : i32, i32
  }
  func.func @transform_2(%arg0: i32) -> (i32, i32) {
    %c0_i32 = arith.constant 0 : i32
    %c0_i32_0 = arith.constant 0 : i32
    %c0_i32_1 = arith.constant 0 : i32
    return %c0_i32, %c0_i32_0 : i32, i32
  }
  func.func @transform_3(%arg0: i32) -> (i32, i32) {
    %c0_i32 = arith.constant 0 : i32
    %c0_i32_0 = arith.constant 0 : i32
    %c0_i32_1 = arith.constant 0 : i32
    return %c0_i32, %c0_i32_0 : i32, i32
  }
  func.func @transform_4(%arg0: i32) -> (i32, i32) {
    %c0_i32 = arith.constant 0 : i32
    %c0_i32_0 = arith.constant 0 : i32
    %c0_i32_1 = arith.constant 0 : i32
    return %c0_i32, %c0_i32_0 : i32, i32
  }
  func.func @transform_5(%arg0: i32) -> (i32, i32) {
    %c0_i32 = arith.constant 0 : i32
    %c0_i32_0 = arith.constant 0 : i32
    %c0_i32_1 = arith.constant 0 : i32
    return %c0_i32, %c0_i32_0 : i32, i32
  }
  func.func @transform_6(%arg0: i32) -> (i32, i32) {
    %c0_i32 = arith.constant 0 : i32
    %c0_i32_0 = arith.constant 0 : i32
    %c0_i32_1 = arith.constant 0 : i32
    return %c0_i32, %c0_i32_0 : i32, i32
  }
  func.func @transform_7(%arg0: i32) -> (i32, i32, i32) {
    %c0_i32 = arith.constant 0 : i32
    %c0_i32_0 = arith.constant 0 : i32
    %c0_i32_1 = arith.constant 0 : i32
    return %arg0, %c0_i32, %c0_i32_0 : i32, i32, i32
  }
}

</mosaic_0001>

<bundles_post_ra>
// kernel: tpu_custom_call.1
= control target key start
LH: loop header
LB: loop body
LE: loop exit
PB: predicated region body
PF: predicated region fallthrough
CT: control target
= control target key end

     0   :  { %12 = vsyncpa [#allocation4], 0  ;;  %s1292_s0 = inlined_call_operand.hbm [shape: f32[2,16,256], index: 0, kind: input, shape index: {}]   ;;  %s1293_s1 = inlined_call_operand.vmem [shape: bf16[8,16], index: 1, kind: input, shape index: {}]   ;;  %s1294_s2 = inlined_call_operand.vmem [shape: f32[8,1], index: 2, kind: input, shape index: {}]   ;;  %s1295_s3 = inlined_call_operand.vmem [shape: bf16[16,8], index: 3, kind: input, shape index: {}]   ;;  %s1296_s4 = inlined_call_operand.vmem [shape: f32[16,1], index: 4, kind: input, shape index: {}]   ;;  %s1297_s5 = inlined_call_operand.vmem [shape: bf16[16,72], index: 5, kind: input, shape index: {}]   ;;  %s1298_s6 = inlined_call_operand.vmem [shape: f32[16,1], index: 6, kind: input, shape index: {}]   ;;  %s1299_s7 = inlined_call_operand.hbm [shape: f32[2,32,256], index: 7, kind: output, shape index: {}]  }
   0x1   :  { %14 = vsyncpa [#allocation4 + $0x1], 0 }
   0x2   :  { %15 = vsyncpa [#allocation5], 0 }
   0x3   :  { %17 = vsyncpa [#allocation5 + $0x1], 0  ;;  %s1047_s24 = smov 0   ;;  %s1049_s25 = smov 0  }
   0x4   :  { %s1051_s26 = smov 0   ;;  %s1053_s27 = smov 0  }
   0x5 LB: > { %s1068_s28 = sadd.s32 4294967295, %s992_s27   ;;  %s737_s29 = sadd.s32 4294967294, %s992_s27   ;;  %s992_s27 = sphi %s1053_s27, %s1321_s27   ;;  %s988_s26 = sphi %s1051_s26, %s1320_s26   ;;  %s984_s25 = sphi %s1049_s25, %s1319_s25   ;;  %s980_s24 = sphi %s1047_s24, %s1318_s24  }
   0x6   : > { %s1072_s30 = sadd.s32 1, %s992_s27   ;;  %s30_s8 = sadd.s32 1, %s988_s26 }
   0x7   : > { %s27_s9 = ssub.s32 %s992_s27, %s1072_s30  ;;  %p37_p0 = scmp.ne.s32.totalorder %s988_s26, %s984_s25 }
   0x8   : > { %p28_p1 = scmp.eq.s32.totalorder %s27_s9, 0  ;;  %p38_p2 = scmp.eq.s32.totalorder %s992_s27, 0 }
   0x9   : > { %p43_p3 = scmp.ne.s32.totalorder %s984_s25, %s980_s24  ;;  %p44_p4 = scmp.eq.s32.totalorder %s1068_s28, 0 }
   0xa   : > { %s1084_s10 = scalar_select %p28_p1, %s988_s26, %s30_s8  }
   0xb   : > { %p1086_p5 = por %p38_p2, %p37_p0  ;;  %p1090_p6 = por %p44_p4, %p43_p3 }
   0xc   : > { %1300 = sst [smem:[#allocation9_spill]] %s1084_s10  ;;  %p193_p7 = scmp.eq.s32.totalorder %s1068_s28, 1 }
   0xd   : > { %p199_p8 = scmp.eq.s32.totalorder %s737_s29, 1  ;;  %p806_p10 = scmp.lt.s32.totalorder %s992_s27, 2 }
   0xe   : > { %p1097_p11 = por %p193_p7, %p37_p0  ;;  %s237_s15 = sand.u32 1, %s988_s26  }
   0xf   : > { %p1101_p12 = por %p199_p8, %p43_p3  ;;  %s765_s16 = sshll.u32 %s992_s27, 5 }
  0x10   : > { %s740_s17 = sshll.u32 %s237_s15, 5  ;;  %s246_s20 = scalar_lea.hbm %s1292_s0, %s765_s16 }
  0x11   : > { %s247_s21 = sshll.u32 %s246_s20, 4  ;;  %s241_s22 = scalar_lea.vmem [#allocation3], %s740_s17  ;;  %s248_s21 = int_to_ptr.hbm [resolvable:$true] %s247_s21 }
  0x12   : > { %s249_s23 = sshll.u32 %s241_s22, 4  ;;  %p1112_p13 = pnand %p806_p10, %p1086_p5  ;;  %s250_s23 = int_to_ptr.vmem [resolvable:$true] %s249_s23 }
  0x13   : > { %p743_p0 = scmp.ge.s32.totalorder %s992_s27, 1  ;;  %p257_p1 = scmp.lt.s32.totalorder %s992_s27, 3 }
  0x14   : > { %s238_s8 = scalar_lea.sflag [#allocation4], %s237_s15  ;;  %s896_s9 = sshra.s32 %s248_s21, 4  ;;  %s897_s9 = int_to_ptr.hbm [resolvable:$true] %s896_s9 }
  0x15   : > { %s898_s10 = scalar_lea.hbm %s897_s9, 32  ;;  %p900_p3 = pneg %p1112_p13 }
  0x16   : > { %p899_p2 = scmp.ne.s32.totalorder %s897_s9, %s898_s10  ;;  %s903_s11 = scalar_lea.hbm %s1292_s0, 64 }
  0x17   : > { %p904_p5 = scmp.lt.s32.totalorder %s897_s9, %s1292_s0  ;;  %p905_p8 = scmp.lt.s32.totalorder %s903_s11, %s898_s10 }
  0x18   : > { %p901_p4 = pnand %p900_p3, %p899_p2 }
  0x19   : > { %p906_p10 = por %p905_p8, %p904_p5 }
  0x1a   : > { %p902_p7 = pneg %p901_p4 }
  0x1c   : > { %p907_p9 = pnand %p906_p10, %p902_p7 }
  0x1e   : > { %910 = shalt.err (!%p907_p9)
}
  0x1f   : > { %s994_s15 = smov 256   ;;  %s995_s20 = smov 16  }
  0x20   : > { %801 = dma.hbm_to_vmem [thread:$0]  (!%p1112_p13), %s248_s21, 512, %s250_s23, %s238_s8, %s994_s15, %s994_s15, %s995_s20  }
  0x21   : > { %p258_p2 = pnand %p743_p0, %p257_p1 }
  0x22   : > { %s1133_s22 = sand.u32 (!%p258_p2), 1, %s984_s25  }
  0x23   : > { %261 = sbr.rel (%p258_p2) target bundleno = 471 (0x1d7), region = 48  ;;  %s744_s10 = sshll.u32 (!%p258_p2), %s1133_s22, 5 }
  0x24   : > { %s264_s9 = scalar_lea.sflag (!%p258_p2), [#allocation4], %s1133_s22  ;;  %s267_s16 = scalar_lea.vmem (!%p258_p2), [#allocation3], %s744_s10 }
  0x28   : > { %971 = dma.done.wait (%p1090_p6), %s264_s9, 512  }
  0x29   : > { %973 = vsyncadd (%p1090_p6), %s264_s9, 4294966784  ;;  %v996_v0 = vmov 0   ;;  %v300_v1 = vld [vmem:[%s267_s16] sm:$0xff]  ;;  %v302_v2 = vld [vmem:[%s267_s16 + $0x10] sm:$0xff]  ;;  %vm313_vm0 = vcmask 130048   ;;  %vm512_vm1 = vcmask 1043456   ;;  %v345_v26 = vlaneseq }
  0x2a   : > { %853 = vset.pattern.permute.xlu0 %v996_v0  ;;  %894 = vset.pattern.permute.xlu1 %v996_v0  ;;  %v301_v3 = vld [vmem:[%s267_s16 + $0x8] sm:$0xff]  ;;  %v304_v4 = vpack.c.bf16 %v302_v2, %v300_v1  ;;  %v303_v5 = vld [vmem:[%s267_s16 + $0x18] sm:$0xff]  ;;  %v307_v6 = vld [vmem:[%s1294_s2] sm:$0xff]  ;;  %s997_s12 = smov 127   ;;  %s998_s17 = smov 113   ;;  %vm508_vm2 = vcmask 64512  }
  0x2b   : > { %895 = vset.pattern.permute.xlu2 %v996_v0  ;;  %v305_v7 = vpack.c.bf16 %v303_v5, %v301_v3  ;;  %310 = vperm.xlu0 %853, %v307_v6   ;;  %v306_v8 = vld [vmem:[%s1293_s1] sm:$0xf]  ;;  %s999_s19 = smov 111   ;;  %s1000_s15 = smov 15   ;;  %v586_v25 = vld [vmem:[%s1298_s6 + $0x8] sm:$0xff]  ;;  %v346_v27 = vand.u32 127, %v345_v26 }
  0x2c   : > { %324 = vmatpush.bf16.msra.mxu2 %v304_v4  ;;  %v766_v22 = vld [vmem:[%s1295_s3] sm:$0xff]  ;;  %s1001_s20 = smov 112   ;;  %s1002_s10 = smov 1   ;;  %v492_v30 = vld [vmem:[%s1296_s4 + $0x8] sm:$0xff]  ;;  %vm478_vm3 = vcmask 908288   ;;  %vm454_vm6 = vcmask 924672  }
  0x2d   : > { %337 = vmatpush.bf16.msra.mxu3 %v305_v7  ;;  %v491_v24 = vld [vmem:[%s1296_s4] sm:$0xff]  ;;  %s1003_s21 = smov 16   ;;  %s1004_s23 = smov 17   ;;  %v347_v28 = vadd.s32 128, %v346_v27  ;;  %v352_v32 = vand.u32 15, %v346_v27  ;;  %vm467_vm8 = vcmask 916480  }
  0x2e   : > { %v585_v31 = vld [vmem:[%s1298_s6] sm:$0xff]  ;;  %vm441_vm10 = vcmask 1039360   ;;  %vm1005_vm12 = vmmov 1   ;;  %vm426_vm14 = vcmask 7168   ;;  %s768_s9 = sshll.u32 %s1068_s28, 6  ;;  %s649_s28 = scalar_lea.sflag [#allocation5], %s1133_s22 }
  0x2f   : > { %746 = vmatmul.msk.bf16.vlgmr.msra.gmra.mxu2 %vm313_vm0, %v306_v8  ;;  %v359_v33 = vand.u32 15, %v347_v28  ;;  %vm1177_vm4 = vcmp.le.s32.totalorder %v352_v32, 14  ;;  %vm1195_vm9 = vcmp.ge.s32.totalorder %v352_v32, 1  ;;  %v767_v32 = vld [vmem:[%s1297_s5] sm:$0xff]  ;;  %s660_s29 = scalar_lea.hbm %s1299_s7, %s768_s9 }
  0x30   : > { %747 = vmatmul.msk.bf16.vlgmr.msra.gmra.mxu3 %vm313_vm0, %v306_v8  ;;  %vm769_vm13 = vmpackc.low %vm1005_vm12, %vm1195_vm9 }
  0x31   : > { %vm1181_vm5 = vcmp.le.s32.totalorder %v359_v33, 14  ;;  %vm1189_vm7 = vcmp.ge.s32.totalorder %v359_v33, 1 }
  0x32   : > { %vm782_vm11 = vmpackc.low %vm467_vm8, %vm1189_vm7 }
  0x33   : > { %vm785_vm15 = vmpackc.low %vm1181_vm5, %vm1005_vm12 }
  0x9d   : > { %v311_v9 = vpop.permute.xlu0 %310 }
  0xb2   : > { %v326_v10 = vpop.f32.mrf.mxu2 }
  0xb3   : > { %v327_v11 = vadd.f32 %v326_v10, %v311_v9  ;;  %v339_v12 = vpop.f32.mrf.mxu3 }
  0xb4   : > { %v340_v13 = vadd.f32 %v339_v12, %v311_v9 }
  0xb5   : > { %v1149_v14 = vmax.f32 %v327_v11, 0.0 }
  0xb6   : > { %v1151_v15 = vmax.f32 %v340_v13, 0.0 }
  0xb7   : > { %v489_v16 = vpack.c.bf16 %v1149_v14, %v1149_v14 }
  0xb8   : > { %v869_v17 = vpack.i.bf16 %v1151_v15, %v1149_v14  ;;  %v490_v18 = vpack.c.bf16 %v1151_v15, %v1151_v15 }
  0xb9   : > { %v514_v19 = vsel %vm512_vm1, %v489_v16, 0 }
  0xba   : > { %870 = vrot.lane.b32.xlu2 %v869_v17, %s997_s12  ;;  %860 = vrot.lane.b32.xlu1 %v869_v17, %s998_s17  ;;  %v328_v20 = vpop.f32.mrf.mxu2  ;;  %v517_v21 = vsel %vm512_vm1, %v490_v18, 0  ;;  %s663_s12 = sshll.u32 %s660_s29, 4  ;;  %s664_s12 = int_to_ptr.hbm [resolvable:$true] %s663_s12 }
  0xbb   : > { %855 = vrot.lane.b32.xlu0 %v869_v17, %s999_s19  ;;  %v341_v23 = vpop.f32.mrf.mxu3  ;;  %526 = vmatpush.bf16.msrb.mxu2 %v514_v19  ;;  %s745_s19 = sshll.u32 %s1133_s22, 6  ;;  %s940_s17 = sshra.s32 %s664_s12, 4  ;;  %s941_s17 = int_to_ptr.hbm [resolvable:$true] %s940_s17 }
  0xbc   : > { %540 = vmatpush.bf16.msrb.mxu3 %v517_v21  ;;  %s942_s11 = scalar_lea.hbm %s941_s17, 64  ;;  %p947_p0 = scmp.lt.s32.totalorder %s941_s17, %s1299_s7 }
  0xbd   : > { %p943_p6 = scmp.ne.s32.totalorder %s941_s17, %s942_s11 }
  0xbe   : > { %752 = vmatmul.msk.bf16.vlgmr.msrb.gmra.mxu2 %vm508_vm2, %v766_v22 }
  0xbf   : > { %753 = vmatmul.msk.bf16.vlgmr.msrb.gmra.mxu3 %vm508_vm2, %v766_v22  ;;  %vm772_vm2 = vmpackc.low %vm1177_vm4, %vm1005_vm12  ;;  %p944_p9 = pnand %p943_p6, %p1097_p11 }
  0xc1   : > { %p945_p13 = pneg %p944_p9 }
  0xc2   : > { %875 = vrot.lane.b32.xlu2 %v869_v17, %s1000_s15  ;;  %865 = vrot.lane.b32.xlu1 %v869_v17, %s1001_s20  ;;  %s946_s15 = scalar_lea.hbm %s1299_s7, 128 }
  0xc3   : > { %880 = vrot.lane.b32.xlu0 %v869_v17, %s1002_s10  ;;  %s1247_s10 = scalar_lea.vmem [#allocation6], %s745_s19  ;;  %p948_p1 = scmp.lt.s32.totalorder %s946_s15, %s942_s11 }
  0xc4   : > { %s661_s8 = sshll.u32 %s1247_s10, 4  ;;  %s662_s8 = int_to_ptr.vmem [resolvable:$true] %s661_s8 }
  0xc5   : > { %p949_p3 = por %p948_p1, %p947_p0 }
  0xc7   : > { %p950_p4 = pnand %p949_p3, %p945_p13 }
  0xca   : > { %890 = vrot.lane.b32.xlu2 %v869_v17, %s1003_s21  ;;  %885 = vrot.lane.b32.xlu1 %v869_v17, %s1004_s23 }
  0xcb   : > { %495 = vperm.xlu0 %853, %v491_v24  }
  0xd2   : > { %500 = vperm.xlu1 %894, %v492_v30   ;;  %589 = vperm.xlu2 %895, %v585_v31  }
  0xd3   : > { %594 = vperm.xlu0 %853, %v586_v25  }
 0x114   : > { %v871_v29 = vpop.permute.xlu2 %870 }
 0x115   : > { %v873_v48 = vunpack.i.h.bf16 %v871_v29  ;;  %v872_v55 = vunpack.i.l.bf16 %v871_v29 }
 0x117   : > { %v445_v63 = vsel %vm441_vm10, %v873_v48, 0.0  ;;  %v442_v3 = vsel %vm441_vm10, %v872_v55, %v873_v48  ;;  %vm1231_vm10 = vmneg %vm313_vm0 }
 0x118   : > { %v786_v7 = vpack.c.bf16 %v445_v63, %v1151_v15  ;;  %v773_v9 = vpack.c.bf16 %v442_v3, %v1149_v14 }
 0x11c   : > { %v876_v42 = vpop.permute.xlu2 %875 }
 0x11d   : > { %v878_v4 = vunpack.i.h.bf16 %v876_v42  ;;  %v877_v5 = vunpack.i.l.bf16 %v876_v42 }
 0x124   : > { %v891_v6 = vpop.permute.xlu2 %890 }
 0x125   : > { %v893_v16 = vunpack.i.h.bf16 %v891_v6  ;;  %v892_v17 = vunpack.i.l.bf16 %v891_v6 }
 0x127   : > { %v399_v27 = vsel %vm313_vm0, %v892_v17, %v893_v16  ;;  %vm602_vm0 = vcmask 588800  }
 0x12c   : > { %v861_v34 = vpop.permute.xlu1 %860 }
 0x12d   : > { %v856_v35 = vpop.permute.xlu0 %855  ;;  %v863_v45 = vunpack.i.h.bf16 %v861_v34  ;;  %v862_v49 = vunpack.i.l.bf16 %v861_v34 }
 0x12e   : > { %v858_v36 = vunpack.i.h.bf16 %v856_v35  ;;  %v857_v37 = vunpack.i.l.bf16 %v856_v35 }
 0x12f   : > { %v458_v59 = vsel %vm454_vm6, %v863_v45, 0.0  ;;  %v455_v61 = vsel %vm454_vm6, %v862_v49, %v863_v45  ;;  %vm788_vm6 = vmpackc.low %vm1189_vm7, %vm1181_vm5 }
 0x130   : > { %v479_v40 = vsel %vm478_vm3, %v857_v37, %v858_v36  ;;  %v482_v41 = vsel %vm478_vm3, %v858_v36, 0.0  ;;  %vm382_vm3 = vcmask 138240  }
 0x131   : > { %v483_v43 = vsel %vm1177_vm4, %v479_v40, 0.0  ;;  %v484_v44 = vsel %vm1181_vm5, %v482_v41, 0.0  ;;  %vm779_vm5 = vmpackc.low %vm1231_vm10, %vm1195_vm9  ;;  %v590_v41 = vpop.permute.xlu2 %589 }
 0x132   : > { %v583_v46 = vpack.c.bf16 %v483_v43, %v483_v43  ;;  %v584_v47 = vpack.c.bf16 %v484_v44, %v484_v44 }
 0x134   : > { %v866_v51 = vpop.permute.xlu1 %865  ;;  %v607_v52 = vsel %vm512_vm1, %v583_v46, 0  ;;  %v610_v53 = vsel %vm512_vm1, %v584_v47, 0  ;;  %vm409_vm1 = vcmask 121856  }
 0x135   : > { %v868_v56 = vunpack.i.h.bf16 %v866_v51  ;;  %v867_v57 = vunpack.i.l.bf16 %v866_v51  ;;  %v881_v58 = vpop.permute.xlu0 %880  ;;  %615 = vmatpush.bf16.msra.mxu0 %v607_v52  ;;  %629 = vmatpush.bf16.msra.mxu1 %v610_v53  ;;  %v410_v18 = vsel %vm409_vm1, %v877_v5, %v878_v4  ;;  %v413_v15 = vsel %vm409_vm1, 0.0, %v877_v5 }
 0x136   : > { %v883_v0 = vunpack.i.h.bf16 %v881_v58  ;;  %v882_v1 = vunpack.i.l.bf16 %v881_v58 }
 0x137   : > { %v783_v60 = vpack.c.bf16 %v868_v56, %v458_v59  ;;  %v468_v62 = vsel %vm467_vm8, %v867_v57, %v868_v56  ;;  %vm775_vm8 = vmpackc.low %vm1195_vm9, %vm1177_vm4 }
 0x138   : > { %v770_v2 = vpack.c.bf16 %v468_v62, %v455_v61  ;;  %v427_v10 = vsel %vm426_vm14, %v882_v1, %v883_v0  ;;  %v430_v11 = vsel %vm426_vm14, 0.0, %v882_v1  ;;  %vm791_vm4 = vmpackc.low %vm1005_vm12, %vm1189_vm7 }
 0x139   : > { %784 = vmatpush.bf16.msk.msra.mxu1 %vm782_vm11, %v783_v60  ;;  %v789_v19 = vpack.c.bf16 %v427_v10, %v410_v18  ;;  %v776_v14 = vpack.c.bf16 %v430_v11, %v413_v15 }
 0x13a   : > { %771 = vmatpush.bf16.msk.msra.mxu0 %vm769_vm13, %v770_v2 }
 0x13c   : > { %v886_v8 = vpop.permute.xlu1 %885 }
 0x13d   : > { %v888_v12 = vunpack.i.h.bf16 %v886_v8  ;;  %v887_v13 = vunpack.i.l.bf16 %v886_v8  ;;  %787 = vmatpush.bf16.msk.msra.mxu1 %vm785_vm15, %v786_v7  ;;  %v496_v23 = vpop.permute.xlu0 %495 }
 0x13e   : > { %774 = vmatpush.bf16.msk.msra.mxu0 %vm772_vm2, %v773_v9 }
 0x13f   : > { %v383_v20 = vsel %vm382_vm3, %v887_v13, %v888_v12  ;;  %v386_v22 = vsel %vm382_vm3, 0.0, %v887_v13 }
 0x140   : > { %v792_v29 = vpack.c.bf16 %v399_v27, %v383_v20  ;;  %v780_v31 = vpack.c.bf16 %v892_v17, %v386_v22 }
 0x141   : > { %v528_v24 = vpop.f32.mrf.mxu2  ;;  %790 = vmatpush.bf16.msk.msra.mxu1 %vm788_vm6, %v789_v19 }
 0x142   : > { %v529_v25 = vadd.f32 %v528_v24, %v496_v23  ;;  %v542_v26 = vpop.f32.mrf.mxu3  ;;  %777 = vmatpush.bf16.msk.msra.mxu0 %vm775_vm8, %v776_v14 }
 0x143   : > { %v543_v28 = vadd.f32 %v542_v26, %v496_v23 }
 0x144   : > { %v547_v30 = vmax.f32 %v529_v25, 0.0  ;;  %v501_v35 = vpop.permute.xlu1 %500 }
 0x145   : > { %v548_v33 = vmax.f32 %v543_v28, 0.0  ;;  %793 = vmatpush.bf16.msk.msra.mxu1 %vm791_vm4, %v792_v29  ;;  %v595_v48 = vpop.permute.xlu0 %594 }
 0x146   : > { %551 = vst [vmem:[%s1247_s10] sm:$0xff] %v547_v30  ;;  %781 = vmatpush.bf16.msk.msra.mxu0 %vm779_vm5, %v780_v31 }
 0x147   : > { %552 = vst [vmem:[%s1247_s10 + $0x8] sm:$0xff] %v548_v33 }
 0x148   : > { %759 = vmatmul.msk.bf16.vlgmr.msra.gmra.mxu1 %vm602_vm0, %v767_v32 }
 0x149   : > { %758 = vmatmul.msk.bf16.vlgmr.msra.gmra.mxu0 %vm602_vm0, %v767_v32  ;;  %v530_v36 = vpop.f32.mrf.mxu2 }
 0x14a   : > { %v544_v34 = vpop.f32.mrf.mxu3  ;;  %v531_v38 = vadd.f32 %v530_v36, %v501_v35 }
 0x14b   : > { %v545_v37 = vadd.f32 %v544_v34, %v501_v35 }
 0x14c   : > { %v549_v40 = vmax.f32 %v531_v38, 0.0 }
 0x14d   : > { %v550_v39 = vmax.f32 %v545_v37, 0.0 }
 0x14e   : > { %553 = vst [vmem:[%s1247_s10 + $0x10] sm:$0xff] %v549_v40 }
 0x14f   : > { %554 = vst [vmem:[%s1247_s10 + $0x18] sm:$0xff] %v550_v39 }
 0x1c5   : > { %v635_v42 = vpop.f32.mrf.mxu1 }
 0x1c6   : > { %v636_v43 = vadd.f32 %v635_v42, %v590_v41  ;;  %v621_v44 = vpop.f32.mrf.mxu0 }
 0x1c7   : > { %v622_v45 = vadd.f32 %v621_v44, %v590_v41 }
 0x1c8   : > { %v641_v46 = vmax.f32 %v636_v43, 0.0 }
 0x1c9   : > { %v640_v47 = vmax.f32 %v622_v45, 0.0 }
 0x1ca   : > { %645 = vst [vmem:[%s1247_s10 + $0x28] sm:$0xff] %v641_v46 }
 0x1cb   : > { %644 = vst [vmem:[%s1247_s10 + $0x20] sm:$0xff] %v640_v47 }
 0x1cd   : > { %v637_v49 = vpop.f32.mrf.mxu1 }
 0x1ce   : > { %v638_v50 = vadd.f32 %v637_v49, %v595_v48  ;;  %v623_v51 = vpop.f32.mrf.mxu0 }
 0x1cf   : > { %v624_v52 = vadd.f32 %v623_v51, %v595_v48 }
 0x1d0   : > { %v643_v53 = vmax.f32 %v638_v50, 0.0 }
 0x1d1   : > { %v642_v54 = vmax.f32 %v624_v52, 0.0 }
 0x1d2   : > { %647 = vst [vmem:[%s1247_s10 + $0x38] sm:$0xff] %v643_v53 }
 0x1d3   : > { %646 = vst [vmem:[%s1247_s10 + $0x30] sm:$0xff] %v642_v54 }
 0x1d4   : > { %953 = shalt.err (!%p950_p4)
}
 0x1d5   : > { %s1006_s22 = smov 256  }
 0x1d6   : > { %796 = dma.vmem_to_hbm [thread:$0]  (%p1097_p11), %s662_s8, 1024, %s664_s12, %s649_s28, %s1006_s22, %s1006_s22, %s1003_s21  }
 0x1d7 PF: > { %s678_s10 = sand.u32 1, %s980_s24   ;;  %p1316_p7 = scmp.ge.s32.totalorder %s992_s27, 2 }
 0x1d8   : > { %s679_s16 = scalar_lea.sflag [#allocation5], %s678_s10 }
 0x1d9   : > { %p803_p5 = pnand %p1316_p7, %p1101_p12 }
 0x1db   : > { %p804_p8 = pneg %p803_p5 }
 0x1dd   : > { %975 = dma.done.wait (%p804_p8), %s679_s16, 1024  }
 0x1de   : > { %977 = vsyncadd (%p804_p8), %s679_s16, 4294966272  ;;  %s1317_s23 = sld [smem:[#allocation9_spill]]  ;;  %p20_p10 = scmp.ge.s32.totalorder %s1072_s30, 4  }
 0x1df   : > { %s1318_s24 = smov %s984_s25  ;;  %s1319_s25 = smov %s988_s26 }
 0x1e0   : > { %s1321_s27 = smov %s1072_s30  ;;  %22 = sbr.rel (!%p20_p10) target bundleno = 5 (0x5), region = 93 }
 0x1e4   : > { %s1320_s26 = smov %s1317_s23 }
 0x1e5   :  { %685 = vsyncpa [#allocation4], 1 }
 0x1e6   :  { %687 = vsyncpa [#allocation4 + $0x1], 1 }
 0x1e7   :  { %688 = vsyncpa [#allocation5], 1 }
 0x1e8   :  { %690 = vsyncpa [#allocation5 + $0x1], 1 }

</bundles_post_ra>
